<compile_context>
chip_gen: v7x
topology: tpu7x:2x2x1
jax: 0.10.0
libtpu: 0.0.40
codegen_flags: <defaults>
</compile_context>

<pallas_src>
import jax
import jax.numpy as jnp
from jax import lax
from jax.experimental import pallas as pl
from jax.experimental.pallas import tpu as pltpu

_LANES = 128
_TR_MAX = 4096          # row-tile cap (4096 rows * 128 lanes * 4 B = 2 MiB f32 / operand)


def _round_up(x, m):
    return -(-x // m) * m


def _device_kind():
    try:
        return jax.devices()[0].device_kind.lower()
    except Exception:
        return ""


def _hw_params():
    """Generation-aware VMEM budgets / core count (conservative when unknown)."""
    kind = _device_kind()
    if ("v2" in kind) or ("v3" in kind):          # tiny-VMEM legacy chips
        tile_budget, vmem_limit = 8 << 20, 14 << 20
    elif any(tag in kind for tag in ("v4", "v5", "v6")):   # 128 MiB VMEM chips
        tile_budget, vmem_limit = 32 << 20, 64 << 20
    else:                                          # v7x (64 MiB) or unknown: be safe
        tile_budget, vmem_limit = 24 << 20, 48 << 20
    cores = 2 if (("v7" in kind) or ("7x" in kind)) else 1
    bf16_ok = ("v6" in kind) or ("v7" in kind) or ("7x" in kind)  # bf16 VALU present
    return tile_budget, vmem_limit, cores, bf16_ok


def _choose_tile(rows, per_row_bytes, budget_bytes, cores):
    """Largest row-tile (multiple of 8, <= rows) fitting the double-buffer budget;
    on multi-TC chips nudge the grid to a multiple of `cores` tiles."""
    cap = max(8, min(_TR_MAX, (budget_bytes // per_row_bytes) // 8 * 8))
    tr = max(8, min(cap, (rows // 8) * 8))
    n_tiles = -(-rows // tr)
    if cores > 1 and n_tiles % cores != 0 and rows >= 8 * cores:
        target = _round_up(n_tiles, cores)
        tr2 = _round_up(-(-rows // target), 64 if rows >= 512 else 8)
        tr2 = max(8, min(tr2, (rows // 8) * 8))
        n2 = -(-rows // tr2)
        if n2 % cores == 0:
            tr, n_tiles = tr2, n2
    return tr, n_tiles


def _make_kernel(n_inputs, tile_rows, chunk_rows, rows_valid, needs_mask, use_bf16):
    steps = tile_rows // chunk_rows
    fold = chunk_rows // 8

    def tile_sum(t_ref, x_refs, base_row, masked):
        def body(c, acc):
            start = pl.multiple_of(c * chunk_rows, chunk_rows)
            sl = pl.ds(start, chunk_rows)
            part = jnp.zeros((chunk_rows, _LANES), jnp.float32)
            if use_bf16:
                t = t_ref[sl, :]                                   # bf16 sub/abs (v6e/v7x)
                for x_ref in x_refs:
                    part = part + jnp.abs(x_ref[sl, :] - t).astype(jnp.float32)
            else:
                t = t_ref[sl, :].astype(jnp.float32)
                for x_ref in x_refs:
                    part = part + jnp.abs(x_ref[sl, :].astype(jnp.float32) - t)
            if masked:
                rid = (base_row + start
                       + lax.broadcasted_iota(jnp.int32, (chunk_rows, _LANES), 0))
                part = jnp.where(rid < rows_valid, part, 0.0)
            return acc + part

        acc = lax.fori_loop(0, steps, body,
                            jnp.zeros((chunk_rows, _LANES), jnp.float32))
        # vreg-wise fold to a single (8,128) lane-dense partial (pure VPU adds)
        return jnp.sum(acc.reshape(fold, 8, _LANES), axis=0)

    def kernel(*refs):
        t_ref = refs[0]
        x_refs = refs[1:1 + n_inputs]
        o_ref = refs[1 + n_inputs]
        r = pl.program_id(0)
        base_row = r * tile_rows
        if needs_mask:
            last = pl.num_programs(0) - 1

            @pl.when(r != last)
            def _():
                o_ref[...] = tile_sum(t_ref, x_refs, base_row, False)

            @pl.when(r == last)
            def _():
                o_ref[...] = tile_sum(t_ref, x_refs, base_row, True)
        else:
            o_ref[...] = tile_sum(t_ref, x_refs, base_row, False)

    return kernel


def l1_loss_greedy(inputs, target):
    """inputs: list/tuple of arrays with target's shape.
    Returns float32 scalar = sum_i mean(|inputs[i] - target|)."""
    inputs = list(inputs)
    n = len(inputs)
    numel = int(target.size)
    tile_budget, vmem_limit, cores, bf16_hw = _hw_params()

    # Lane-dense 2-D slab view of every operand.
    rows_exact, rem = divmod(numel, _LANES)
    if rem == 0 and rows_exact >= 8:
        rows = rows_exact                  # pure reshape, no HBM copy
        slab_elems = numel
    else:
        # TODO(synk): rare lane-ragged shapes still pay one jnp.pad copy; avoiding
        # it would need a manual-DMA (pl.ANY) path which isn't worth the code here.
        slab_elems = _round_up(max(numel, 8 * _LANES), 8 * _LANES)
        rows = slab_elems // _LANES

    def as_slab(a):
        flat = a.reshape(-1)
        if slab_elems != numel:
            flat = jnp.pad(flat, (0, slab_elems - numel))   # zeros: |0-0| adds nothing
        return flat.reshape(rows, _LANES)                   # native dtype kept

    t2d = as_slab(target)
    x2ds = [as_slab(x) for x in inputs]

    # Double-buffer budget uses each operand's actual itemsize.
    per_row = 2 * _LANES * sum(jnp.dtype(a.dtype).itemsize for a in [target] + inputs)
    tr, num_tiles = _choose_tile(rows, per_row, tile_budget, cores)
    needs_mask = (rows % tr) != 0
    chunk = next(c for c in (64, 32, 16, 8) if tr % c == 0)
    use_bf16 = bf16_hw and all(a.dtype == jnp.bfloat16 for a in [target] + inputs)

    tile_spec = pl.BlockSpec((tr, _LANES), lambda r: (r, 0))
    partials = pl.pallas_call(
        _make_kernel(n, tr, chunk, rows, needs_mask, use_bf16),
        out_shape=jax.ShapeDtypeStruct((num_tiles * 8, _LANES), jnp.float32),
        grid=(num_tiles,),
        in_specs=[tile_spec] * (n + 1),
        out_specs=pl.BlockSpec((8, _LANES), lambda r: (r, 0)),
        compiler_params=pltpu.CompilerParams(
            dimension_semantics=("parallel",),
            vmem_limit_bytes=vmem_limit,
        ),
    )(t2d, *x2ds)

    # sum of per-input means = (total abs-diff sum) / numel(target)
    return (jnp.sum(partials) / jnp.float32(numel)).astype(jnp.float32)


if __name__ == "__main__":
    key = jax.random.PRNGKey(0)

    # Test 1: NCHW float32, fully aligned numel (zero-copy path).
    B, C, H, W = 2, 4, 16, 16
    N_INPUTS = 3
    k_t, *k_xs = jax.random.split(key, N_INPUTS + 1)
    target = jax.random.normal(k_t, (B, C, H, W), dtype=jnp.float32)
    inputs = [jax.random.normal(k, (B, C, H, W), dtype=jnp.float32) for k in k_xs]
    out = jax.block_until_ready(l1_loss_greedy(inputs, target))
    ref = sum(jnp.mean(jnp.abs(x - target)) for x in inputs)
    assert jnp.allclose(out, ref, rtol=1e-5, atol=1e-5), (out, ref)

    # Test 2: lane-ragged numel with bf16 operands (small pad fallback + bf16 math).
    k2 = jax.random.PRNGKey(1)
    k_t2, k_a, k_b = jax.random.split(k2, 3)
    target2 = jax.random.normal(k_t2, (2, 3, 7, 5), dtype=jnp.bfloat16)
    inputs2 = [jax.random.normal(k_a, (2, 3, 7, 5), dtype=jnp.bfloat16),
               jax.random.normal(k_b, (2, 3, 7, 5), dtype=jnp.bfloat16)]
    out2 = jax.block_until_ready(l1_loss_greedy(inputs2, target2))
    ref2 = sum(jnp.mean(jnp.abs(x.astype(jnp.float32) - target2.astype(jnp.float32)))
               for x in inputs2)
    assert jnp.allclose(out2, ref2, rtol=1e-2, atol=1e-2), (out2, ref2)

    # Test 3: numel multiple of 128 but rows not a multiple of the tile
    # (exercises the zero-copy path + in-kernel tail masking).
    k3 = jax.random.PRNGKey(2)
    k_t3, k_c, k_d = jax.random.split(k3, 3)
    target3 = jax.random.normal(k_t3, (2, 3, 5, 128), dtype=jnp.float32)
    inputs3 = [jax.random.normal(k_c, (2, 3, 5, 128), dtype=jnp.float32),
               jax.random.normal(k_d, (2, 3, 5, 128), dtype=jnp.float32)]
    out3 = jax.block_until_ready(l1_loss_greedy(inputs3, target3))
    ref3 = sum(jnp.mean(jnp.abs(x - target3)) for x in inputs3)
    assert jnp.allclose(out3, ref3, rtol=1e-5, atol=1e-5), (out3, ref3)

    # Test 4: larger aligned slab with mixed dtypes (multi-chunk fori_loop path).
    k4 = jax.random.PRNGKey(3)
    k_t4, k_e, k_f = jax.random.split(k4, 3)
    target4 = jax.random.normal(k_t4, (2, 4, 64, 128), dtype=jnp.float32)
    inputs4 = [jax.random.normal(k_e, (2, 4, 64, 128), dtype=jnp.float32),
               jax.random.normal(k_f, (2, 4, 64, 128), dtype=jnp.bfloat16)]
    out4 = jax.block_until_ready(l1_loss_greedy(inputs4, target4))
    ref4 = sum(jnp.mean(jnp.abs(x.astype(jnp.float32) - target4)) for x in inputs4)
    assert jnp.allclose(out4, ref4, rtol=1e-4, atol=1e-5), (out4, ref4)

    print("KERNEL_OK")
</pallas_src>

<mosaic_0001>
module attributes {stable_mosaic.version = 11 : i64} {
  func.func @kernel(%arg0: i32, %arg1: memref<16x128xf32, #tpu.memory_space<vmem>>, %arg2: memref<16x128xf32, #tpu.memory_space<vmem>>, %arg3: memref<16x128xf32, #tpu.memory_space<vmem>>, %arg4: memref<16x128xf32, #tpu.memory_space<vmem>>, %arg5: memref<8x128xf32, #tpu.memory_space<vmem>>) attributes {dimension_semantics = [#tpu.dimension_semantics<parallel>], iteration_bounds = array<i64: 1>, scalar_prefetch = 0 : i64, scratch_operands = 0 : i64, tpu.core_type = #tpu.core_type<tc>, window_params = [{transform_indices = @transform_0, window_bounds = array<i64: 16, 128>}, {transform_indices = @transform_1, window_bounds = array<i64: 16, 128>}, {transform_indices = @transform_2, window_bounds = array<i64: 16, 128>}, {transform_indices = @transform_3, window_bounds = array<i64: 16, 128>}, {transform_indices = @transform_4, window_bounds = array<i64: 8, 128>}]} {
    %cst = arith.constant 0.000000e+00 : f32
    %0 = vector.broadcast %cst : f32 to vector<16x128xf32>
    %c0_i32 = arith.constant 0 : i32
    %c16_i32 = arith.constant 16 : i32
    %1 = arith.muli %c0_i32, %c16_i32 : i32
    %2 = tpu.assume_multiple %1, 16 : i32
    %cst_0 = arith.constant 0.000000e+00 : f32
    %3 = vector.broadcast %cst_0 : f32 to vector<16x128xf32>
    %4 = arith.index_cast %2 : i32 to index
    %c0 = arith.constant 0 : index
    %5 = vector.load %arg1[%4, %c0] : memref<16x128xf32, #tpu.memory_space<vmem>>, vector<16x128xf32>
    %6 = arith.index_cast %2 : i32 to index
    %c0_1 = arith.constant 0 : index
    %7 = vector.load %arg2[%6, %c0_1] : memref<16x128xf32, #tpu.memory_space<vmem>>, vector<16x128xf32>
    %8 = arith.subf %7, %5 : vector<16x128xf32>
    %9 = math.absf %8 : vector<16x128xf32>
    %10 = arith.addf %3, %9 : vector<16x128xf32>
    %11 = arith.index_cast %2 : i32 to index
    %c0_2 = arith.constant 0 : index
    %12 = vector.load %arg3[%11, %c0_2] : memref<16x128xf32, #tpu.memory_space<vmem>>, vector<16x128xf32>
    %13 = arith.subf %12, %5 : vector<16x128xf32>
    %14 = math.absf %13 : vector<16x128xf32>
    %15 = arith.addf %10, %14 : vector<16x128xf32>
    %16 = arith.index_cast %2 : i32 to index
    %c0_3 = arith.constant 0 : index
    %17 = vector.load %arg4[%16, %c0_3] : memref<16x128xf32, #tpu.memory_space<vmem>>, vector<16x128xf32>
    %18 = arith.subf %17, %5 : vector<16x128xf32>
    %19 = math.absf %18 : vector<16x128xf32>
    %20 = arith.addf %15, %19 : vector<16x128xf32>
    %21 = arith.addf %0, %20 : vector<16x128xf32>
    %c1_i32 = arith.constant 1 : i32
    %22 = vector.shape_cast %21 : vector<16x128xf32> to vector<2x8x128xf32>
    %cst_4 = arith.constant dense<0.000000e+00> : vector<8x128xf32>
    %23 = vector.multi_reduction <add>, %22, %cst_4 [0] : vector<2x8x128xf32> to vector<8x128xf32>
    %c0_5 = arith.constant 0 : index
    %c0_6 = arith.constant 0 : index
    %24 = vector.load %arg5[%c0_5, %c0_6] : memref<8x128xf32, #tpu.memory_space<vmem>>, vector<8x128xf32>
    tpu.vector_store %arg5[%c0_5, %c0_6], %23 {strides = array<i32>} : memref<8x128xf32, #tpu.memory_space<vmem>>, vector<8x128xf32>,
    return
  }
  func.func @transform_0(%arg0: i32) -> (i32, i32) {
    %c0_i32 = arith.constant 0 : i32
    %c0_i32_0 = arith.constant 0 : i32
    return %arg0, %c0_i32 : i32, i32
  }
  func.func @transform_1(%arg0: i32) -> (i32, i32) {
    %c0_i32 = arith.constant 0 : i32
    %c0_i32_0 = arith.constant 0 : i32
    return %arg0, %c0_i32 : i32, i32
  }
  func.func @transform_2(%arg0: i32) -> (i32, i32) {
    %c0_i32 = arith.constant 0 : i32
    %c0_i32_0 = arith.constant 0 : i32
    return %arg0, %c0_i32 : i32, i32
  }
  func.func @transform_3(%arg0: i32) -> (i32, i32) {
    %c0_i32 = arith.constant 0 : i32
    %c0_i32_0 = arith.constant 0 : i32
    return %arg0, %c0_i32 : i32, i32
  }
  func.func @transform_4(%arg0: i32) -> (i32, i32) {
    %c0_i32 = arith.constant 0 : i32
    %c0_i32_0 = arith.constant 0 : i32
    return %arg0, %c0_i32 : i32, i32
  }
}

</mosaic_0001>

<bundles_post_ra>
// kernel: tpu_custom_call.1
= control target key start
LH: loop header
LB: loop body
LE: loop exit
PB: predicated region body
PF: predicated region fallthrough
CT: control target
= control target key end

     0   :  { %9 = vsyncpa [#allocation3], 0  ;;  %s363_s0 = inlined_call_operand.hbm [shape: f32[16,128], index: 0, kind: input, shape index: {}]   ;;  %s364_s1 = inlined_call_operand.hbm [shape: f32[16,128], index: 1, kind: input, shape index: {}]   ;;  %s365_s2 = inlined_call_operand.hbm [shape: f32[16,128], index: 2, kind: input, shape index: {}]   ;;  %s366_s3 = inlined_call_operand.hbm [shape: f32[16,128], index: 3, kind: input, shape index: {}]   ;;  %s367_s4 = inlined_call_operand.hbm [shape: f32[8,128], index: 4, kind: output, shape index: {}]  }
   0x1   :  { %10 = vsyncpa [#allocation6], 0 }
   0x2   :  { %11 = vsyncpa [#allocation9], 0 }
   0x3   :  { %12 = vsyncpa [#allocation4], 0  ;;  %s245_s15 = smov [#allocation5]   ;;  %s246_s17 = smov [#allocation2]  }
   0x4   :  { %s30_s16 = sshll.u32 %s245_s15, 4  ;;  %s18_s18 = sshll.u32 %s246_s17, 4  ;;  %s31_s16 = int_to_ptr.vmem [resolvable:$true] %s30_s16  ;;  %s277_s18 = int_to_ptr.vmem [resolvable:$true] %s18_s18 }
   0x5   :  { %s127_s21 = scalar_lea.hbm %s364_s1, 256 }
   0x6   :  { %p128_p0 = scmp.ne.s32.totalorder %s364_s1, %s127_s21  ;;  %p131_p1 = scmp.lt.u32.totalorder %s127_s21, %s364_s1 }
   0x8   :  { %p133_p2 = pnand %p131_p1, %p128_p0 }
   0xa   :  { %136 = shalt.err (!%p133_p2)
}
   0xb   :  { %s137_s26 = scalar_lea.vmem %s31_s16, 256  ;;  %p142_p4 = scmp.lt.s32.totalorder %s31_s16, %s31_s16 }
   0xc   :  { %p138_p3 = scmp.ne.s32.totalorder %s31_s16, %s137_s26  ;;  %p143_p5 = scmp.lt.s32.totalorder %s137_s26, %s137_s26 }
   0xe   :  { %p144_p6 = por %p143_p5, %p142_p4 }
  0x10   :  { %p145_p7 = pnand %p144_p6, %p138_p3 }
  0x12   :  { %148 = shalt.err (!%p145_p7)
}
  0x13   :  { %s247_s27 = smov 128   ;;  %s248_s28 = smov 8  }
  0x14   :  { %36 = dma.hbm_to_vmem [thread:$0]  %s364_s1, 256, %s31_s16, [#allocation6], %s247_s27, %s247_s27, %s248_s28  }
  0x15   :  { %s149_s7 = scalar_lea.hbm %s363_s0, 256 }
  0x16   :  { %p150_p8 = scmp.ne.s32.totalorder %s363_s0, %s149_s7  ;;  %p153_p9 = scmp.lt.u32.totalorder %s149_s7, %s363_s0 }
  0x18   :  { %p155_p10 = pnand %p153_p9, %p150_p8 }
  0x1a   :  { %158 = shalt.err (!%p155_p10)
}
  0x1b   :  { %s159_s12 = scalar_lea.vmem %s277_s18, 256  ;;  %p164_p12 = scmp.lt.s32.totalorder %s277_s18, %s277_s18 }
  0x1c   :  { %p160_p11 = scmp.ne.s32.totalorder %s277_s18, %s159_s12  ;;  %p165_p13 = scmp.lt.s32.totalorder %s159_s12, %s159_s12 }
  0x1e   :  { %p166_p0 = por %p165_p13, %p164_p12 }
  0x20   :  { %p167_p1 = pnand %p166_p0, %p160_p11 }
  0x22   :  { %170 = shalt.err (!%p167_p1)
}
  0x23   :  { %24 = dma.hbm_to_vmem [thread:$0]  %s363_s0, 256, %s277_s18, [#allocation3], %s247_s27, %s247_s27, %s248_s28  }
  0x24   :  { %s249_s14 = smov [#allocation7]   ;;  %s250_s16 = smov [#allocation8]  }
  0x25   :  { %s42_s15 = sshll.u32 %s249_s14, 4  ;;  %s54_s17 = sshll.u32 %s250_s16, 4  ;;  %s43_s15 = int_to_ptr.vmem [resolvable:$true] %s42_s15  ;;  %s314_s17 = int_to_ptr.vmem [resolvable:$true] %s54_s17 }
  0x26   :  { %s171_s21 = scalar_lea.hbm %s365_s2, 256 }
  0x27   :  { %p172_p2 = scmp.ne.s32.totalorder %s365_s2, %s171_s21  ;;  %p175_p3 = scmp.lt.u32.totalorder %s171_s21, %s365_s2 }
  0x29   :  { %p177_p4 = pnand %p175_p3, %p172_p2 }
  0x2b   :  { %180 = shalt.err (!%p177_p4)
}
  0x2c   :  { %s181_s0 = scalar_lea.vmem %s43_s15, 256  ;;  %p186_p6 = scmp.lt.s32.totalorder %s43_s15, %s43_s15 }
  0x2d   :  { %p182_p5 = scmp.ne.s32.totalorder %s43_s15, %s181_s0  ;;  %p187_p7 = scmp.lt.s32.totalorder %s181_s0, %s181_s0 }
  0x2f   :  { %p188_p8 = por %p187_p7, %p186_p6 }
  0x31   :  { %p189_p9 = pnand %p188_p8, %p182_p5 }
  0x33   :  { %192 = shalt.err (!%p189_p9)
}
  0x34   :  { %48 = dma.hbm_to_vmem [thread:$0]  %s365_s2, 256, %s43_s15, [#allocation6], %s247_s27, %s247_s27, %s248_s28  }
  0x35   :  { %s193_s5 = scalar_lea.hbm %s366_s3, 256 }
  0x36   :  { %p194_p10 = scmp.ne.s32.totalorder %s366_s3, %s193_s5  ;;  %p197_p11 = scmp.lt.u32.totalorder %s193_s5, %s366_s3 }
  0x38   :  { %p199_p12 = pnand %p197_p11, %p194_p10 }
  0x3a   :  { %202 = shalt.err (!%p199_p12)
}
  0x3b   :  { %s203_s10 = scalar_lea.vmem %s314_s17, 256  ;;  %p208_p0 = scmp.lt.s32.totalorder %s314_s17, %s314_s17 }
  0x3c   :  { %p204_p13 = scmp.ne.s32.totalorder %s314_s17, %s203_s10  ;;  %p209_p1 = scmp.lt.s32.totalorder %s203_s10, %s203_s10 }
  0x3e   :  { %p210_p2 = por %p209_p1, %p208_p0 }
  0x40   :  { %p211_p3 = pnand %p210_p2, %p204_p13 }
  0x42   :  { %214 = shalt.err (!%p211_p3)
}
  0x43   :  { %60 = dma.hbm_to_vmem [thread:$0]  %s366_s3, 256, %s314_s17, [#allocation9], %s247_s27, %s247_s27, %s248_s28  }
  0x44   :  { %237 = dma.done.wait [#allocation3], 256  }
  0x45   :  { %238 = vsyncadd [#allocation3], 4294967040 }
  0x46   :  { %239 = dma.done.wait [#allocation6], 512  }
  0x47   :  { %240 = vsyncadd [#allocation6], 4294966784 }
  0x48   :  { %241 = dma.done.wait [#allocation9], 256  }
  0x49   :  { %242 = vsyncadd [#allocation9], 4294967040  ;;  %v73_v0 = vld [vmem:[#allocation2] sm:$0xff]  ;;  %v74_v1 = vld [vmem:[#allocation2 + $0x8] sm:$0xff]  ;;  %s251_s3 = smov [#allocation10]  }
  0x4a   :  { %v75_v2 = vld [vmem:[#allocation5] sm:$0xff]  ;;  %v76_v3 = vld [vmem:[#allocation5 + $0x8] sm:$0xff]  ;;  %v83_v5 = vld [vmem:[#allocation7] sm:$0xff]  ;;  %s109_s27 = sshll.u32 %s251_s3, 4  ;;  %s110_s27 = int_to_ptr.vmem [resolvable:$true] %s109_s27 }
  0x4b   :  { %v77_v4 = vsub.f32 %v75_v2, %v73_v0  ;;  %v84_v6 = vld [vmem:[#allocation7 + $0x8] sm:$0xff]  ;;  %v78_v7 = vsub.f32 %v76_v3, %v74_v1  ;;  %v85_v8 = vsub.f32 %v83_v5, %v73_v0  ;;  %v91_v10 = vld [vmem:[#allocation8] sm:$0xff]  ;;  %v92_v11 = vld [vmem:[#allocation8 + $0x8] sm:$0xff]  ;;  %s215_s28 = scalar_lea.vmem %s110_s27, 128  ;;  %p220_p5 = scmp.lt.s32.totalorder %s110_s27, %s110_s27 }
  0x4c   :  { %v86_v9 = vsub.f32 %v84_v6, %v74_v1  ;;  %v93_v13 = vsub.f32 %v91_v10, %v73_v0  ;;  %v94_v14 = vsub.f32 %v92_v11, %v74_v1  ;;  %p216_p4 = scmp.ne.s32.totalorder %s110_s27, %s215_s28  ;;  %p221_p6 = scmp.lt.s32.totalorder %s215_s28, %s215_s28 }
  0x4d   :  { %v79_v12 = vand.u32 2147483647, %v77_v4  ;;  %v80_v15 = vand.u32 2147483647, %v78_v7  ;;  %v87_v16 = vand.u32 2147483647, %v85_v8 }
  0x4e   :  { %v88_v17 = vand.u32 2147483647, %v86_v9  ;;  %v95_v18 = vand.u32 2147483647, %v93_v13  ;;  %v96_v19 = vand.u32 2147483647, %v94_v14  ;;  %p222_p7 = por %p221_p6, %p220_p5 }
  0x4f   :  { %v89_v20 = vadd.f32 %v87_v16, %v79_v12 }
  0x50   :  { %v90_v21 = vadd.f32 %v88_v17, %v80_v15  ;;  %p223_p8 = pnand %p222_p7, %p216_p4 }
  0x51   :  { %v97_v22 = vadd.f32 %v95_v18, %v89_v20 }
  0x52   :  { %v98_v23 = vadd.f32 %v96_v19, %v90_v21 }
  0x54   :  { %v101_v24 = vadd.f32 %v98_v23, %v97_v22 }
  0x56   :  { %102 = vst [vmem:[#allocation10] sm:$0xff] %v101_v24 }
  0x57   :  { %226 = shalt.err (!%p223_p8)
}
  0x58   :  { %s227_s13 = scalar_lea.hbm %s367_s4, 128 }
  0x59   :  { %p228_p9 = scmp.ne.s32.totalorder %s367_s4, %s227_s13  ;;  %p231_p10 = scmp.lt.u32.totalorder %s227_s13, %s367_s4 }
  0x5b   :  { %p233_p11 = pnand %p231_p10, %p228_p9 }
  0x5d   :  { %236 = shalt.err (!%p233_p11)
}
  0x5e   :  { %112 = dma.vmem_to_hbm [thread:$0]  %s110_s27, 128, %s367_s4, [#allocation4]  }
  0x5f   :  { %243 = dma.done.wait [#allocation4], 128  }
  0x60   :  { %244 = vsyncadd [#allocation4], 4294967168 }
  0x61   :  { %116 = vsyncpa [#allocation3], 1 }
  0x62   :  { %117 = vsyncpa [#allocation6], 1 }
  0x63   :  { %118 = vsyncpa [#allocation9], 1 }
  0x64   :  { %119 = vsyncpa [#allocation4], 1 }

</bundles_post_ra>
